<compile_context>
chip_gen: v5e
topology: v5e:2x2
jax: 0.10.0
libtpu: 0.0.40
codegen_flags: <defaults>
</compile_context>

<pallas_src>
import jax
import jax.numpy as jnp
from jax import lax
from jax.experimental import pallas as pl
from jax.experimental.pallas import tpu as pltpu

LEAKY_SLOPE = 0.2
BN_EPS = 1e-5


# ----------------------------- Pallas kernel bodies -----------------------------

def _conv_stats_kernel(r0_ref, r1_ref, w_ref, conv_ref, stats_ref):
    """Fused im2col conv for one (batch, output-row) grid step.

    r0_ref / r1_ref : (Wo+1, 4*Cin) bf16 space-to-depth rows ho and ho+1
                      (i.e. padded input rows 2ho..2ho+1 and 2ho+2..2ho+3).
    w_ref           : (4, 4*Cin, Cout) bf16 regrouped conv weight, first index = 2*dh+dw.
    conv_ref        : (Wo, Cout) bf16 conv output row.
    stats_ref       : (2, Cout) f32 per-tile partial sum / sum-of-squares
                      (partials per grid step -> no cross-iteration accumulator,
                       both grid axes stay "parallel").
    """
    wo = conv_ref.shape[0]
    r0 = r0_ref[...]
    r1 = r1_ref[...]
    acc = jnp.zeros(conv_ref.shape, jnp.float32)
    # Four shifted-slice matmuls accumulate the 4x4 / stride-2 conv (no MXU inflation).
    for idx, (rows, dw) in enumerate(((r0, 0), (r0, 1), (r1, 0), (r1, 1))):
        acc = acc + jnp.dot(rows[dw:dw + wo, :], w_ref[idx],
                            preferred_element_type=jnp.float32)
    conv_ref[...] = acc.astype(conv_ref.dtype)
    s = jnp.sum(acc, axis=0, keepdims=True)          # (1, Cout)
    q = jnp.sum(acc * acc, axis=0, keepdims=True)    # (1, Cout)
    stats_ref[...] = jnp.concatenate([s, q], axis=0)


def _bn_lrelu_kernel(conv_ref, scale_ref, shift_ref, out_ref):
    """Fused BatchNorm affine apply + LeakyReLU(0.2); elementwise math in f32 (v5e-safe)."""
    y = conv_ref[...].astype(jnp.float32) * scale_ref[...] + shift_ref[...]
    out_ref[...] = jnp.where(y > 0, y, LEAKY_SLOPE * y).astype(out_ref.dtype)


# --------------------------------- helpers ---------------------------------------

def _vmem_capacity_bytes():
    try:
        return int(pltpu.get_tpu_info().vmem_capacity_bytes)
    except Exception:
        return 64 * 1024 * 1024           # conservative default: v7x per-TC VMEM


def _compiler_params(sem, est_vmem_bytes, vmem_cap):
    kw = dict(dimension_semantics=sem)
    if est_vmem_bytes > 24 * 1024 * 1024:  # only raise when the tile plan needs it
        kw["vmem_limit_bytes"] = int(min(max(est_vmem_bytes * 5 // 4, 32 * 1024 * 1024),
                                         vmem_cap * 85 // 100))
    return pltpu.CompilerParams(**kw)


def _pick_row_tile(n_rows, max_rows):
    """Largest divisor of n_rows that is a multiple of 8 and <= max_rows.

    Falls back to n_rows itself (a single full-extent block is always layout-legal)."""
    best = 0
    d = 8
    limit = min(n_rows, max(max_rows, 8))
    while d <= limit:
        if n_rows % d == 0:
            best = d
        d += 8
    return best if best else n_rows


# --------------------------------- forward ---------------------------------------

def unet_down(x_nchw, conv_w, gamma, beta, *, bn=True, out_dtype=jnp.bfloat16):
    """Forward pass of UNetDown (PyTorch layouts: x NCHW, conv_w (Cout, Cin, 4, 4)).

    TODO(synk): when chaining UNetDown layers, accept/return NHWC bf16 directly so the
    NCHW<->NHWC transposes at this boundary are not paid once per layer.
    """
    N, Cin, H, W = x_nchw.shape
    Cout = conv_w.shape[0]
    assert conv_w.shape == (Cout, Cin, 4, 4)
    assert H % 2 == 0 and W % 2 == 0
    Ho, Wo = H // 2, W // 2
    M = N * Ho * Wo
    vmem_cap = _vmem_capacity_bytes()

    # ---- XLA glue, all bf16 (~1x input bytes; no 4x f32 im2col HBM round trip) ----
    x_nhwc = jnp.transpose(x_nchw.astype(jnp.bfloat16), (0, 2, 3, 1))
    x_pad = jnp.pad(x_nhwc, ((0, 0), (1, 1), (1, 1), (0, 0)))   # (N, H+2, W+2, Cin)
    # space-to-depth of 2x2 blocks: x_s2d[n, i, j, (a*2+b)*Cin + c] = x_pad[n, 2i+a, 2j+b, c]
    x_s2d = (x_pad.reshape(N, Ho + 1, 2, Wo + 1, 2, Cin)
             .transpose(0, 1, 3, 2, 4, 5)
             .reshape(N, Ho + 1, Wo + 1, 4 * Cin))

    # conv weight regrouped to match: wf[2*dh+dw, (a*2+b)*Cin + ci, co] = w[co, ci, 2dh+a, 2dw+b]
    wt = jnp.transpose(conv_w.astype(jnp.float32), (2, 3, 1, 0))   # (kh, kw, ci, co)
    wf = (wt.reshape(2, 2, 2, 2, Cin, Cout)                        # (dh, a, dw, b, ci, co)
          .transpose(0, 2, 1, 3, 4, 5)                             # (dh, dw, a, b, ci, co)
          .reshape(4, 4 * Cin, Cout)
          .astype(jnp.bfloat16))

    # ---- Pallas kernel 1: fused conv (4 shifted-slice matmuls) + partial BN stats ----
    w_bytes = 4 * 4 * Cin * Cout * 2
    w_kwargs = {}
    if w_bytes >= (1 << 20):        # single-buffer the constant weight only when big
        w_kwargs["pipeline_mode"] = pl.Buffered(1)
    w_spec = pl.BlockSpec((4, 4 * Cin, Cout), lambda n, h: (0, 0, 0), **w_kwargs)

    row_in_bytes = (Wo + 1) * 4 * Cin * 2
    est1 = (2 * 2 * row_in_bytes                      # two s2d row blocks, double-buffered
            + (1 if w_kwargs else 2) * w_bytes        # conv weight
            + 2 * (Wo * Cout * 2 + 2 * Cout * 4))     # conv row + stats outputs

    conv, stats = pl.pallas_call(
        _conv_stats_kernel,
        out_shape=(jax.ShapeDtypeStruct((N, Ho, Wo, Cout), jnp.bfloat16),
                   jax.ShapeDtypeStruct((N, Ho, 2, Cout), jnp.float32)),
        grid_spec=pltpu.PrefetchScalarGridSpec(
            num_scalar_prefetch=0,
            grid=(N, Ho),
            in_specs=[pl.BlockSpec((None, None, Wo + 1, 4 * Cin),
                                   lambda n, h: (n, h, 0, 0)),
                      pl.BlockSpec((None, None, Wo + 1, 4 * Cin),
                                   lambda n, h: (n, h + 1, 0, 0)),
                      w_spec],
            out_specs=(pl.BlockSpec((None, None, Wo, Cout), lambda n, h: (n, h, 0, 0)),
                       pl.BlockSpec((None, None, 2, Cout), lambda n, h: (n, h, 0, 0)))),
        compiler_params=_compiler_params(("parallel", "parallel"), est1, vmem_cap),
    )(x_s2d, x_s2d, wf)

    # ---- per-channel BN scalars (training-mode batch stats), f32, XLA-side ----
    if bn:
        s_t = stats[:, :, 0, :].reshape(-1, Cout)     # per-row-tile sums      (T, Cout)
        q_t = stats[:, :, 1, :].reshape(-1, Cout)     # per-row-tile sum-of-sq (T, Cout)
        cnt = float(Wo)
        total = float(M)
        mean = jnp.sum(s_t, axis=0) / total
        m_t = s_t / cnt
        m2_t = q_t - s_t * s_t / cnt                  # per-tile centred second moments
        var = (jnp.sum(m2_t, axis=0)
               + cnt * jnp.sum((m_t - mean) ** 2, axis=0)) / total
        var = jnp.maximum(var, 0.0)                   # biased var (PyTorch train-mode BN)
        inv_std = lax.rsqrt(var + BN_EPS)
        scale = gamma.astype(jnp.float32) * inv_std
        shift = beta.astype(jnp.float32) - mean * scale
    else:
        scale = jnp.ones((Cout,), jnp.float32)
        shift = jnp.zeros((Cout,), jnp.float32)
    # TODO(synk): BatchNorm2d running-stats update (momentum=0.8) is training-state
    # bookkeeping only and does not affect this forward output; not implemented here.

    # ---- Pallas kernel 2: fused normalize + LeakyReLU over a lane-dense slab ----
    # TODO(synk): for layers whose conv slab fits VMEM, fold this into kernel 1 as a
    # second "arbitrary" grid phase to drop the bf16 intermediate's HBM round trip.
    L = Wo * Cout
    Mr = N * Ho
    conv2 = conv.reshape(Mr, L)                       # free (row-major) reshape
    scale_row = jnp.tile(scale, Wo).reshape(1, L)
    shift_row = jnp.tile(shift, Wo).reshape(1, L)

    row_vmem = 4 * 2 * L                              # bf16 in + bf16 out, double-buffered
    budget = min(12 * (1 << 20), vmem_cap // 6)
    cap_rows = max(1, budget // row_vmem)
    if Mr >= 16:
        cap_rows = min(cap_rows, Mr // 2)             # keep >=2 grid steps (v7x megacore)
    tm2 = _pick_row_tile(Mr, cap_rows)
    est2 = 2 * 2 * tm2 * L * 2 + 2 * 2 * L * 4

    out2 = pl.pallas_call(
        _bn_lrelu_kernel,
        out_shape=jax.ShapeDtypeStruct((Mr, L), out_dtype),
        grid_spec=pltpu.PrefetchScalarGridSpec(
            num_scalar_prefetch=0,
            grid=(Mr // tm2,),
            in_specs=[pl.BlockSpec((tm2, L), lambda m: (m, 0)),
                      pl.BlockSpec((1, L), lambda m: (0, 0)),
                      pl.BlockSpec((1, L), lambda m: (0, 0))],
            out_specs=pl.BlockSpec((tm2, L), lambda m: (m, 0))),
        compiler_params=_compiler_params(("parallel",), est2, vmem_cap),
    )(conv2, scale_row, shift_row)

    out = out2.reshape(N, Ho, Wo, Cout)               # free reshape
    return jnp.transpose(out, (0, 3, 1, 2))           # back to NCHW (cheap, bf16)


# --------------------------------- reference --------------------------------------

def _reference(x_nchw, conv_w, gamma, beta, bn=True):
    """Plain-JAX f32 reference matching PyTorch UNetDown.forward in train mode."""
    y = lax.conv_general_dilated(
        x_nchw.astype(jnp.float32), conv_w.astype(jnp.float32),
        window_strides=(2, 2), padding=((1, 1), (1, 1)),
        dimension_numbers=("NCHW", "OIHW", "NCHW"))
    if bn:
        mean = jnp.mean(y, axis=(0, 2, 3), keepdims=True)
        var = jnp.mean((y - mean) ** 2, axis=(0, 2, 3), keepdims=True)
        y = (y - mean) / jnp.sqrt(var + BN_EPS)
        y = y * gamma.reshape(1, -1, 1, 1) + beta.reshape(1, -1, 1, 1)
    return jnp.where(y > 0, y, LEAKY_SLOPE * y)


if __name__ == "__main__":
    key = jax.random.PRNGKey(0)
    k_x, k_w, k_g, k_b = jax.random.split(key, 4)

    N, Cin, H, W = 2, 4, 16, 16
    Cout = 8

    x = jax.random.normal(k_x, (N, Cin, H, W), dtype=jnp.float32)
    # Conv2d default init: uniform with bound = 1/sqrt(fan_in)
    bound = 1.0 / (Cin * 4 * 4) ** 0.5
    conv_w = jax.random.uniform(k_w, (Cout, Cin, 4, 4), jnp.float32, -bound, bound)
    # BatchNorm affine params (perturbed deterministically from defaults gamma=1, beta=0)
    gamma = 1.0 + 0.05 * jax.random.normal(k_g, (Cout,), jnp.float32)
    beta = 0.05 * jax.random.normal(k_b, (Cout,), jnp.float32)

    fwd = jax.jit(unet_down, static_argnames=("bn", "out_dtype"))
    out = fwd(x, conv_w, gamma, beta, bn=True)
    out = jax.block_until_ready(out)

    ref = _reference(x, conv_w, gamma, beta, bn=True)
    assert out.shape == (N, Cout, H // 2, W // 2), out.shape
    # bf16 MXU operands, bf16 conv intermediate and bf16 output -> bf16-level tolerance.
    max_diff = float(jnp.max(jnp.abs(out.astype(jnp.float32) - ref)))
    assert max_diff < 5e-2, max_diff

    print("KERNEL_OK")
</pallas_src>

<mosaic_0001>
module attributes {stable_mosaic.version = 11 : i64} {
  func.func @_conv_stats_kernel(%arg0: i32, %arg1: i32, %arg2: memref<1x1x9x16xbf16, #tpu.memory_space<vmem>>, %arg3: memref<1x1x9x16xbf16, #tpu.memory_space<vmem>>, %arg4: memref<4x16x8xbf16, #tpu.memory_space<vmem>>, %arg5: memref<1x1x8x8xbf16, #tpu.memory_space<vmem>>, %arg6: memref<1x1x2x8xf32, #tpu.memory_space<vmem>>) attributes {dimension_semantics = [#tpu.dimension_semantics<parallel>, #tpu.dimension_semantics<parallel>], iteration_bounds = array<i64: 2, 8>, scalar_prefetch = 0 : i64, scratch_operands = 0 : i64, tpu.core_type = #tpu.core_type<tc>, window_params = [{transform_indices = @transform_0, window_bounds = array<i64: 1, 1, 9, 16>}, {transform_indices = @transform_1, window_bounds = array<i64: 1, 1, 9, 16>}, {pipeline_mode = #tpu.pipeline_mode<synchronous>, transform_indices = @transform_2, window_bounds = array<i64: 4, 16, 8>}, {transform_indices = @transform_3, window_bounds = array<i64: 1, 1, 8, 8>}, {transform_indices = @transform_4, window_bounds = array<i64: 1, 1, 2, 8>}]} {
    %c0 = arith.constant 0 : index
    %c0_0 = arith.constant 0 : index
    %c0_1 = arith.constant 0 : index
    %c0_2 = arith.constant 0 : index
    %0 = vector.load %arg2[%c0, %c0_0, %c0_1, %c0_2] : memref<1x1x9x16xbf16, #tpu.memory_space<vmem>>, vector<1x1x9x16xbf16>
    %1 = vector.shape_cast %0 : vector<1x1x9x16xbf16> to vector<9x16xbf16>
    %c0_3 = arith.constant 0 : index
    %c0_4 = arith.constant 0 : index
    %c0_5 = arith.constant 0 : index
    %c0_6 = arith.constant 0 : index
    %2 = vector.load %arg3[%c0_3, %c0_4, %c0_5, %c0_6] : memref<1x1x9x16xbf16, #tpu.memory_space<vmem>>, vector<1x1x9x16xbf16>
    %3 = vector.shape_cast %2 : vector<1x1x9x16xbf16> to vector<9x16xbf16>
    %cst = arith.constant 0.000000e+00 : f32
    %4 = vector.broadcast %cst : f32 to vector<8x8xf32>
    %5 = vector.extract_strided_slice %1 {offsets = [0, 0], sizes = [8, 16], strides = [1, 1]} : vector<9x16xbf16> to vector<8x16xbf16>
    %c0_7 = arith.constant 0 : index
    %c0_8 = arith.constant 0 : index
    %c0_9 = arith.constant 0 : index
    %6 = vector.load %arg4[%c0_7, %c0_8, %c0_9] : memref<4x16x8xbf16, #tpu.memory_space<vmem>>, vector<1x16x8xbf16>
    %7 = vector.shape_cast %6 : vector<1x16x8xbf16> to vector<16x8xbf16>
    %cst_10 = arith.constant dense<0.000000e+00> : vector<8x8xf32>
    %8 = tpu.matmul %5, %7, %cst_10 {dimension_numbers = #tpu.dot_dimension_numbers<[1], [0], [0], [1], [0, 0, 1, 1], [], []>} : vector<8x16xbf16>, vector<16x8xbf16>, vector<8x8xf32> -> vector<8x8xf32>
    %9 = arith.addf %4, %8 : vector<8x8xf32>
    %10 = vector.extract_strided_slice %1 {offsets = [1, 0], sizes = [8, 16], strides = [1, 1]} : vector<9x16xbf16> to vector<8x16xbf16>
    %c1 = arith.constant 1 : index
    %c0_11 = arith.constant 0 : index
    %c0_12 = arith.constant 0 : index
    %11 = vector.load %arg4[%c1, %c0_11, %c0_12] : memref<4x16x8xbf16, #tpu.memory_space<vmem>>, vector<1x16x8xbf16>
    %12 = vector.shape_cast %11 : vector<1x16x8xbf16> to vector<16x8xbf16>
    %cst_13 = arith.constant dense<0.000000e+00> : vector<8x8xf32>
    %13 = tpu.matmul %10, %12, %cst_13 {dimension_numbers = #tpu.dot_dimension_numbers<[1], [0], [0], [1], [0, 0, 1, 1], [], []>} : vector<8x16xbf16>, vector<16x8xbf16>, vector<8x8xf32> -> vector<8x8xf32>
    %14 = arith.addf %9, %13 : vector<8x8xf32>
    %15 = vector.extract_strided_slice %3 {offsets = [0, 0], sizes = [8, 16], strides = [1, 1]} : vector<9x16xbf16> to vector<8x16xbf16>
    %c2 = arith.constant 2 : index
    %c0_14 = arith.constant 0 : index
    %c0_15 = arith.constant 0 : index
    %16 = vector.load %arg4[%c2, %c0_14, %c0_15] : memref<4x16x8xbf16, #tpu.memory_space<vmem>>, vector<1x16x8xbf16>
    %17 = vector.shape_cast %16 : vector<1x16x8xbf16> to vector<16x8xbf16>
    %cst_16 = arith.constant dense<0.000000e+00> : vector<8x8xf32>
    %18 = tpu.matmul %15, %17, %cst_16 {dimension_numbers = #tpu.dot_dimension_numbers<[1], [0], [0], [1], [0, 0, 1, 1], [], []>} : vector<8x16xbf16>, vector<16x8xbf16>, vector<8x8xf32> -> vector<8x8xf32>
    %19 = arith.addf %14, %18 : vector<8x8xf32>
    %20 = vector.extract_strided_slice %3 {offsets = [1, 0], sizes = [8, 16], strides = [1, 1]} : vector<9x16xbf16> to vector<8x16xbf16>
    %c3 = arith.constant 3 : index
    %c0_17 = arith.constant 0 : index
    %c0_18 = arith.constant 0 : index
    %21 = vector.load %arg4[%c3, %c0_17, %c0_18] : memref<4x16x8xbf16, #tpu.memory_space<vmem>>, vector<1x16x8xbf16>
    %22 = vector.shape_cast %21 : vector<1x16x8xbf16> to vector<16x8xbf16>
    %cst_19 = arith.constant dense<0.000000e+00> : vector<8x8xf32>
    %23 = tpu.matmul %20, %22, %cst_19 {dimension_numbers = #tpu.dot_dimension_numbers<[1], [0], [0], [1], [0, 0, 1, 1], [], []>} : vector<8x16xbf16>, vector<16x8xbf16>, vector<8x8xf32> -> vector<8x8xf32>
    %24 = arith.addf %19, %23 : vector<8x8xf32>
    %25 = arith.truncf %24 : vector<8x8xf32> to vector<8x8xbf16>
    %c0_20 = arith.constant 0 : index
    %c0_21 = arith.constant 0 : index
    %c0_22 = arith.constant 0 : index
    %c0_23 = arith.constant 0 : index
    %26 = vector.load %arg5[%c0_20, %c0_21, %c0_22, %c0_23] : memref<1x1x8x8xbf16, #tpu.memory_space<vmem>>, vector<1x1x8x8xbf16>
    %27 = vector.shape_cast %26 : vector<1x1x8x8xbf16> to vector<8x8xbf16>
    %28 = vector.shape_cast %25 : vector<8x8xbf16> to vector<1x1x8x8xbf16>
    tpu.vector_store %arg5[%c0_20, %c0_21, %c0_22, %c0_23], %28 {strides = array<i32>} : memref<1x1x8x8xbf16, #tpu.memory_space<vmem>>, vector<1x1x8x8xbf16>,
    %cst_24 = arith.constant dense<0.000000e+00> : vector<8xf32>
    %29 = vector.multi_reduction <add>, %24, %cst_24 [0] : vector<8x8xf32> to vector<8xf32>
    %30 = vector.shape_cast %29 : vector<8xf32> to vector<1x8xf32>
    %31 = arith.mulf %24, %24 : vector<8x8xf32>
    %cst_25 = arith.constant dense<0.000000e+00> : vector<8xf32>
    %32 = vector.multi_reduction <add>, %31, %cst_25 [0] : vector<8x8xf32> to vector<8xf32>
    %33 = vector.shape_cast %32 : vector<8xf32> to vector<1x8xf32>
    %34 = tpu.concatenate %30, %33 in 0 : vector<1x8xf32>, vector<1x8xf32> -> vector<2x8xf32>
    %c0_26 = arith.constant 0 : index
    %c0_27 = arith.constant 0 : index
    %c0_28 = arith.constant 0 : index
    %c0_29 = arith.constant 0 : index
    %35 = vector.load %arg6[%c0_26, %c0_27, %c0_28, %c0_29] : memref<1x1x2x8xf32, #tpu.memory_space<vmem>>, vector<1x1x2x8xf32>
    %36 = vector.shape_cast %35 : vector<1x1x2x8xf32> to vector<2x8xf32>
    %37 = vector.shape_cast %34 : vector<2x8xf32> to vector<1x1x2x8xf32>
    tpu.vector_store %arg6[%c0_26, %c0_27, %c0_28, %c0_29], %37 {strides = array<i32>} : memref<1x1x2x8xf32, #tpu.memory_space<vmem>>, vector<1x1x2x8xf32>,
    return
  }
  func.func @transform_0(%arg0: i32, %arg1: i32) -> (i32, i32, i32, i32) {
    %c0_i32 = arith.constant 0 : i32
    %c0_i32_0 = arith.constant 0 : i32
    %c0_i32_1 = arith.constant 0 : i32
    return %arg0, %arg1, %c0_i32, %c0_i32_0 : i32, i32, i32, i32
  }
  func.func @transform_1(%arg0: i32, %arg1: i32) -> (i32, i32, i32, i32) {
    %c1_i32 = arith.constant 1 : i32
    %0 = arith.addi %arg1, %c1_i32 : i32
    %c0_i32 = arith.constant 0 : i32
    %c0_i32_0 = arith.constant 0 : i32
    %c0_i32_1 = arith.constant 0 : i32
    return %arg0, %0, %c0_i32, %c0_i32_0 : i32, i32, i32, i32
  }
  func.func @transform_2(%arg0: i32, %arg1: i32) -> (i32, i32, i32) {
    %c0_i32 = arith.constant 0 : i32
    %c0_i32_0 = arith.constant 0 : i32
    %c0_i32_1 = arith.constant 0 : i32
    %c0_i32_2 = arith.constant 0 : i32
    return %c0_i32, %c0_i32_0, %c0_i32_1 : i32, i32, i32
  }
  func.func @transform_3(%arg0: i32, %arg1: i32) -> (i32, i32, i32, i32) {
    %c0_i32 = arith.constant 0 : i32
    %c0_i32_0 = arith.constant 0 : i32
    %c0_i32_1 = arith.constant 0 : i32
    return %arg0, %arg1, %c0_i32, %c0_i32_0 : i32, i32, i32, i32
  }
  func.func @transform_4(%arg0: i32, %arg1: i32) -> (i32, i32, i32, i32) {
    %c0_i32 = arith.constant 0 : i32
    %c0_i32_0 = arith.constant 0 : i32
    %c0_i32_1 = arith.constant 0 : i32
    return %arg0, %arg1, %c0_i32, %c0_i32_0 : i32, i32, i32, i32
  }
}

module attributes {stable_mosaic.version = 11 : i64} {
  func.func @_bn_lrelu_kernel(%arg0: i32, %arg1: memref<8x64xbf16, #tpu.memory_space<vmem>>, %arg2: memref<1x64xf32, #tpu.memory_space<vmem>>, %arg3: memref<1x64xf32, #tpu.memory_space<vmem>>, %arg4: memref<8x64xbf16, #tpu.memory_space<vmem>>) attributes {dimension_semantics = [#tpu.dimension_semantics<parallel>], iteration_bounds = array<i64: 2>, scalar_prefetch = 0 : i64, scratch_operands = 0 : i64, tpu.core_type = #tpu.core_type<tc>, window_params = [{transform_indices = @transform_0, window_bounds = array<i64: 8, 64>}, {pipeline_mode = #tpu.pipeline_mode<synchronous>, transform_indices = @transform_1, window_bounds = array<i64: 1, 64>}, {pipeline_mode = #tpu.pipeline_mode<synchronous>, transform_indices = @transform_2, window_bounds = array<i64: 1, 64>}, {transform_indices = @transform_3, window_bounds = array<i64: 8, 64>}]} {
    %c0 = arith.constant 0 : index
    %c0_0 = arith.constant 0 : index
    %0 = vector.load %arg1[%c0, %c0_0] : memref<8x64xbf16, #tpu.memory_space<vmem>>, vector<8x64xbf16>
    %1 = arith.extf %0 : vector<8x64xbf16> to vector<8x64xf32>
    %c0_1 = arith.constant 0 : index
    %c0_2 = arith.constant 0 : index
    %2 = vector.load %arg2[%c0_1, %c0_2] : memref<1x64xf32, #tpu.memory_space<vmem>>, vector<1x64xf32>
    %3 = vector.broadcast %2 : vector<1x64xf32> to vector<8x64xf32>
    %4 = arith.mulf %1, %3 : vector<8x64xf32>
    %c0_3 = arith.constant 0 : index
    %c0_4 = arith.constant 0 : index
    %5 = vector.load %arg3[%c0_3, %c0_4] : memref<1x64xf32, #tpu.memory_space<vmem>>, vector<1x64xf32>
    %6 = vector.broadcast %5 : vector<1x64xf32> to vector<8x64xf32>
    %7 = arith.addf %4, %6 : vector<8x64xf32>
    %cst = arith.constant 0.000000e+00 : f32
    %8 = vector.broadcast %cst : f32 to vector<8x64xf32>
    %9 = arith.cmpf ogt, %7, %8 : vector<8x64xf32>
    %cst_5 = arith.constant 2.000000e-01 : f32
    %10 = vector.broadcast %cst_5 : f32 to vector<8x64xf32>
    %11 = arith.mulf %10, %7 : vector<8x64xf32>
    %12 = arith.select %9, %7, %11 : vector<8x64xi1>, vector<8x64xf32>
    %13 = arith.truncf %12 : vector<8x64xf32> to vector<8x64xbf16>
    %c0_6 = arith.constant 0 : index
    %c0_7 = arith.constant 0 : index
    %14 = vector.load %arg4[%c0_6, %c0_7] : memref<8x64xbf16, #tpu.memory_space<vmem>>, vector<8x64xbf16>
    tpu.vector_store %arg4[%c0_6, %c0_7], %13 {strides = array<i32>} : memref<8x64xbf16, #tpu.memory_space<vmem>>, vector<8x64xbf16>,
    return
  }
  func.func @transform_0(%arg0: i32) -> (i32, i32) {
    %c0_i32 = arith.constant 0 : i32
    %c0_i32_0 = arith.constant 0 : i32
    return %arg0, %c0_i32 : i32, i32
  }
  func.func @transform_1(%arg0: i32) -> (i32, i32) {
    %c0_i32 = arith.constant 0 : i32
    %c0_i32_0 = arith.constant 0 : i32
    %c0_i32_1 = arith.constant 0 : i32
    return %c0_i32, %c0_i32_0 : i32, i32
  }
  func.func @transform_2(%arg0: i32) -> (i32, i32) {
    %c0_i32 = arith.constant 0 : i32
    %c0_i32_0 = arith.constant 0 : i32
    %c0_i32_1 = arith.constant 0 : i32
    return %c0_i32, %c0_i32_0 : i32, i32
  }
  func.func @transform_3(%arg0: i32) -> (i32, i32) {
    %c0_i32 = arith.constant 0 : i32
    %c0_i32_0 = arith.constant 0 : i32
    return %arg0, %c0_i32 : i32, i32
  }
}

</mosaic_0001>

<bundles_post_ra>
// kernel: tile.13
= control target key start
LH: loop header
LB: loop body
LE: loop exit
PB: predicated region body
PF: predicated region fallthrough
CT: control target
= control target key end

     0   :  { %s22_s0 = inlined_call_operand.vmem [shape: f32[8], index: 0, kind: input, shape index: {}]   ;;  %s23_s1 = inlined_call_operand.vmem [shape: f32[8,8], index: 1, kind: output, shape index: {}]  }
   0x1   :  { %v4_v0 = vld [vmem:[%s22_s0] ss:$0 sm:$0xff] }
   0x2   :  { %5 = vst [vmem:[%s23_s1] sm:$0xff] %v4_v0 }

// kernel: tile.14
= control target key start
LH: loop header
LB: loop body
LE: loop exit
PB: predicated region body
PF: predicated region fallthrough
CT: control target
= control target key end

     0   :  { %s67_s10 = smov 56   ;;  %s68_s11 = smov 40   ;;  %vm3_vm0 = vcmask 64512   ;;  %vm9_vm1 = vcmask 523712   ;;  %vm15_vm2 = vcmask 458112   ;;  %vm21_vm3 = vcmask 392512   ;;  %s111_s0 = inlined_call_operand.vmem [shape: f32[8,8], index: 0, kind: input, shape index: {}]   ;;  %s112_s1 = inlined_call_operand.vmem [shape: f32[1,64], index: 1, kind: output, shape index: {}]  }
   0x1   :  { %v53_v0 = vld [vmem:[%s111_s0 + $0x7] sm:$0x1]   ;;  %v55_v1 = vld [vmem:[%s111_s0 + $0x5] sm:$0x1]   ;;  %v57_v2 = vld [vmem:[%s111_s0 + $0x3] sm:$0x1]  }
   0x2   :  { %7 = vrot.lane.b32.xlu0 %v53_v0, %s67_s10  ;;  %19 = vrot.lane.b32.xlu1 %v55_v1, %s68_s11  ;;  %s69_s14 = smov 24   ;;  %v54_v3 = vld [vmem:[%s111_s0 + $0x6] sm:$0x1]   ;;  %v56_v4 = vld [vmem:[%s111_s0 + $0x4] sm:$0x1]   ;;  %s70_s21 = smov 48  }
   0x3   :  { %31 = vrot.lane.b32.xlu2 %v57_v2, %s69_s14  ;;  %v58_v5 = vld [vmem:[%s111_s0 + $0x2] sm:$0x1]   ;;  %s71_s22 = smov 32   ;;  %s72_s23 = smov 16   ;;  %v59_v6 = vld [vmem:[%s111_s0 + $0x1] sm:$0x1]  }
   0x4   :  { %s73_s26 = smov 8   ;;  %v2_v7 = vld [vmem:[%s111_s0] sm:$0x1]   ;;  %vm27_vm4 = vcmask 326912   ;;  %vm33_vm5 = vcmask 261312   ;;  %vm39_vm6 = vcmask 195712  }
   0x5   :  { %4 = vst.msk [vmem:[#allocation0] sm:$0x1] %vm3_vm0, %v2_v7   ;;  %vm45_vm7 = vcmask 130112  }
   0xa   :  { %13 = vrot.lane.b32.xlu0 %v54_v3, %s70_s21  ;;  %25 = vrot.lane.b32.xlu1 %v56_v4, %s71_s22 }
   0xb   :  { %37 = vrot.lane.b32.xlu2 %v58_v5, %s72_s23 }
  0x12   :  { %43 = vrot.lane.b32.xlu0 %v59_v6, %s73_s26 }
  0x5d   :  { %v32_v8 = vpop.permute.xlu2 %31  }
  0x65   :  { %v38_v9 = vpop.permute.xlu2 %37  }
  0x74   :  { %v8_v10 = vpop.permute.xlu0 %7   ;;  %v20_v11 = vpop.permute.xlu1 %19  }
  0x75   :  { %10 = vst.msk [vmem:[#allocation0] sm:$0x1] %vm9_vm1, %v8_v10  }
  0x7c   :  { %v14_v12 = vpop.permute.xlu0 %13   ;;  %v26_v13 = vpop.permute.xlu1 %25  }
  0x7d   :  { %16 = vst.msk [vmem:[#allocation0] sm:$0x1] %vm15_vm2, %v14_v12  }
  0x7e   :  { %22 = vst.msk [vmem:[#allocation0] sm:$0x1] %vm21_vm3, %v20_v11  }
  0x7f   :  { %28 = vst.msk [vmem:[#allocation0] sm:$0x1] %vm27_vm4, %v26_v13  }
  0x80   :  { %34 = vst.msk [vmem:[#allocation0] sm:$0x1] %vm33_vm5, %v32_v8  }
  0x81   :  { %40 = vst.msk [vmem:[#allocation0] sm:$0x1] %vm39_vm6, %v38_v9  }
  0x84   :  { %v44_v14 = vpop.permute.xlu0 %43  }
  0x85   :  { %46 = vst.msk [vmem:[#allocation0] sm:$0x1] %vm45_vm7, %v44_v14  }
  0x8c   :  { %v49_v15 = vld [vmem:[#allocation0] sm:$0x1] }
  0x8d   :  { %52 = vst [vmem:[%s112_s1] sm:$0x1] %v49_v15 }

// kernel: unet_down.2
= control target key start
LH: loop header
LB: loop body
LE: loop exit
PB: predicated region body
PF: predicated region fallthrough
CT: control target
= control target key end

     0   :  { %s766_s15 = smov 0   ;;  %s768_s16 = smov 0   ;;  %s854_s0 = inlined_call_operand.vmem [shape: bf16[2,9,9,16], index: 0, kind: input, shape index: {}, may-alias: {0,1}]   ;;  %s855_s1 = inlined_call_operand.vmem [shape: bf16[2,9,9,16], index: 1, kind: input, shape index: {}, may-alias: {0,1}]   ;;  %s856_s2 = inlined_call_operand.vmem [shape: bf16[4,16,8], index: 2, kind: input, shape index: {}]   ;;  %s857_s3 = inlined_call_operand.vmem [shape: bf16[2,8,8,8], index: 3, kind: output, shape index: {0}]   ;;  %s858_s4 = inlined_call_operand.vmem [shape: f32[2,8,2,8], index: 4, kind: output, shape index: {1}]  }
   0x1   :  { %s770_s17 = smov 0   ;;  %s772_s18 = smov 0  }
   0x2   :  { %s774_s19 = smov 0  }
   0x3 LB: > { %s24_s20 = sadd.s32 1, %s731_s17  ;;  %s27_s21 = sadd.s32 1, %s735_s18  ;;  %s739_s19 = sphi %s774_s19, %s15_s19   ;;  %s735_s18 = sphi %s772_s18, %s862_s18   ;;  %s731_s17 = sphi %s770_s17, %s861_s17   ;;  %s727_s16 = sphi %s768_s16, %s860_s16   ;;  %s723_s15 = sphi %s766_s15, %s859_s15  }
   0x4   : > { %p25_p0 = scmp.ge.s32.totalorder %s24_s20, 8  ;;  %p609_p1 = scmp.ge.s32.totalorder %s739_s19, 1 }
   0x5   : > { %p207_p2 = scmp.lt.s32.totalorder %s739_s19, 17 }
   0x6   : > { %s864_s20 = smov (%p25_p0, %s24_s20), 0  ;;  %s866_s21 = smov (!%p25_p0, %s27_s21), %s735_s18 }
   0x7   : > { %p208_p3 = pnand %p609_p1, %p207_p2  ;;  %p29_p4 = scmp.ge.s32.totalorder %s866_s21, 2 }
   0x8   : > { %p258_p5 = scmp.lt.s32.totalorder (!%p208_p3), %s727_s16, 1  ;;  %s267_s26 = sadd.s32 (!%p208_p3), 1, %s723_s15 }
   0x9   : > { %s868_s21 = smov (%p29_p4, %s866_s21), 0  ;;  %211 = sbr.rel (%p208_p3) target bundleno = 181 (0xb5), region = 32 }
   0xa   : > { %p270_p6 = scmp.lt.s32.totalorder (!%p208_p3), %s267_s26, 8  ;;  %p260_p7 = scmp.lt.s32.totalorder (!%p208_p3), %s723_s15, 8 }
   0xb   : > { %p280_p8 = scmp.lt.s32.totalorder (!%p208_p3), %s723_s15, 7 }
   0xe   : > { %v658_v0 = vld [vmem:[%s856_s2 + $0x10] sm:$0xff]  ;;  %v656_v1 = vld [vmem:[%s856_s2] sm:$0xff]  ;;  %v657_v2 = vld [vmem:[%s856_s2 + $0x8] sm:$0xff]  ;;  %s870_s16 = smov (!%p258_p5, %s727_s16), 1  ;;  %s872_s26 = smov (!%p270_p6, %s267_s26), 8  ;;  %vm322_vm0 = vcmask 130048  }
   0xf   : > { %v659_v3 = vld [vmem:[%s856_s2 + $0x18] sm:$0xff]  ;;  %380 = vmatpush.bf16.msra.mxu2 %v658_v0  ;;  %355 = vmatpush.bf16.msra.mxu1 %v656_v1  ;;  %s660_s5 = smul.u32 18, %s870_s16  ;;  %s612_s6 = sshll.u32 %s872_s26, 1  ;;  %vm428_vm1 = vcmask 64512   ;;  %vm426_vm2 = vcmask 60416   ;;  %vm444_vm3 = vcmask 1040384  }
  0x10   : > { %333 = vmatpush.bf16.msra.mxu0 %v657_v2  ;;  %418 = vmatpush.bf16.msra.mxu3 %v659_v3  ;;  %s261_s12 = scalar_select %p260_p7, %s723_s15, 8  ;;  %vm446_vm4 = vcmask 58368  }
  0x11   : > { %s274_s7 = sadd.s32 %s660_s5, %s612_s6  ;;  %s874_s15 = smov (!%p280_p8, %s723_s15), 7 }
  0x12   : > { %s613_s8 = sshll.u32 %s274_s7, 2  ;;  %s610_s13 = sshll.u32 %s261_s12, 1 }
  0x13   : > { %s276_s11 = scalar_lea.vmem %s855_s1, %s613_s8  ;;  %s264_s14 = sadd.s32 %s660_s5, %s610_s13 }
  0x14   : > { %v297_v4 = vld [vmem:[%s276_s11] sm:$0xf]  ;;  %v655_v6 = vld [vmem:[%s276_s11] sm:$0x10]  ;;  %s611_s22 = sshll.u32 %s264_s14, 2  ;;  %s614_s26 = sshll.u32 %s870_s16, 3 }
  0x15   : > { %v645_v5 = vld [vmem:[%s276_s11] sm:$0xf]  ;;  %640 = vmatmul.msk.bf16.vlgmr.msra.gmra.mxu2 %vm322_vm0, %v297_v4  ;;  %s266_s25 = scalar_lea.vmem %s854_s0, %s611_s22  ;;  %s829_s27 = sadd.s32 %s614_s26, %s874_s15 }
  0x16   : > { %v646_v7 = vor.u32 %v655_v6, %v645_v5  ;;  %v295_v11 = vld [vmem:[%s266_s25] sm:$0xf]  ;;  %v654_v13 = vld [vmem:[%s266_s25] sm:$0x10]  ;;  %s615_s28 = sshll.u32 %s829_s27, 2  ;;  %s617_s15 = sshll.u32 %s829_s27, 1 }
  0x17   : > { %v622_v12 = vld [vmem:[%s266_s25] sm:$0xf]  ;;  %633 = vmatmul.msk.bf16.vlgmr.msra.gmra.mxu1 %vm322_vm0, %v295_v11  ;;  %s285_s5 = scalar_lea.vmem %s857_s3, %s615_s28  ;;  %s293_s7 = scalar_lea.vmem %s858_s4, %s617_s15 }
  0x18   : > { %v396_v8 = vshrl.u32 %v646_v7, 16  ;;  %v398_v9 = vshll.u32 %v646_v7, 16  ;;  %v623_v14 = vor.u32 %v654_v13, %v622_v12 }
  0x1a   : > { %v400_v10 = vrot.slane %v398_v9, 1  ;;  %v310_v16 = vshrl.u32 %v623_v14, 16  ;;  %v312_v17 = vshll.u32 %v623_v14, 16 }
  0x1c   : > { %v401_v15 = vor.u32 %v400_v10, %v396_v8  ;;  %v314_v18 = vrot.slane %v312_v17, 1 }
  0x1e   : > { %651 = vmatmul.msk.bf16.vlgmr.msra.gmra.mxu3 %vm322_vm0, %v401_v15  ;;  %v315_v19 = vor.u32 %v314_v18, %v310_v16 }
  0x20   : > { %628 = vmatmul.msk.bf16.vlgmr.msra.gmra.mxu0 %vm322_vm0, %v315_v19 }
  0x94   : > { %v357_v21 = vpop.f32.mrf.mxu1 }
  0x98   : > { %v382_v20 = vpop.f32.mrf.mxu2 }
  0x9c   : > { %v359_v24 = vpop.f32.mrf.mxu1 }
  0x9d   : > { %v335_v23 = vpop.f32.mrf.mxu0 }
  0x9e   : > { %v358_v25 = vadd.f32 %v357_v21, %v335_v23 }
  0xa0   : > { %v384_v22 = vpop.f32.mrf.mxu2  ;;  %v386_v27 = vadd.f32 %v382_v20, %v358_v25 }
  0xa1   : > { %v420_v26 = vpop.f32.mrf.mxu3 }
  0xa2   : > { %v424_v28 = vadd.f32 %v420_v26, %v386_v27 }
  0xa4   : > { %v425_v29 = vpack.c.bf16 %v424_v28, %v424_v28  ;;  %v429_v30 = vsel %vm428_vm1, %v424_v28, 0.0  ;;  %v436_v31 = vmul.f32 %v424_v28, %v424_v28 }
  0xa5   : > { %v430_v32 = vrot.slane %v429_v30, 4  ;;  %v337_v33 = vpop.f32.mrf.mxu0 }
  0xa6   : > { %427 = vst.msk [vmem:[%s285_s5] sm:$0xf] %vm426_vm2, %v425_v29  ;;  %v437_v34 = vsel %vm428_vm1, %v436_v31, 0.0 }
  0xa7   : > { %v431_v36 = vadd.f32 %v430_v32, %v429_v30  ;;  %v438_v37 = vrot.slane %v437_v34, 4 }
  0xa9   : > { %v422_v35 = vpop.f32.mrf.mxu3  ;;  %v432_v38 = vrot.slane %v431_v36, 2  ;;  %v439_v39 = vadd.f32 %v438_v37, %v437_v34 }
  0xab   : > { %v433_v40 = vadd.f32 %v432_v38, %v431_v36  ;;  %v440_v41 = vrot.slane %v439_v39, 2 }
  0xad   : > { %v434_v42 = vrot.slane %v433_v40, 1  ;;  %v441_v43 = vadd.f32 %v440_v41, %v439_v39 }
  0xaf   : > { %v442_v44 = vrot.slane %v441_v43, 1  ;;  %v435_v45 = vadd.f32 %v434_v42, %v433_v40 }
  0xb1   : > { %v443_v46 = vadd.f32 %v442_v44, %v441_v43 }
  0xb3   : > { %v445_v47 = vsel %vm444_vm3, %v435_v45, %v443_v46 }
  0xb4   : > { %447 = vst.msk [vmem:[%s293_s7] sm:$0x3] %vm446_vm4, %v445_v47 }
  0xb5 PF: > { %s15_s19 = sadd.s32 1, %s739_s19   ;;  %s859_s15 = smov %s731_s17 }
  0xb6   : > { %p12_p9 = scmp.ge.s32.totalorder %s15_s19, 18   ;;  %s860_s16 = smov %s735_s18 }
  0xb7   : > { %s861_s17 = smov %s864_s20  ;;  %s862_s18 = smov %s868_s21 }
  0xb8   :  { %14 = sbr.rel (!%p12_p9) target bundleno = 3 (0x3), region = 80 }

// kernel: unet_down.3
= control target key start
LH: loop header
LB: loop body
LE: loop exit
PB: predicated region body
PF: predicated region fallthrough
CT: control target
= control target key end

     0   :  { %s284_s12 = smov 0   ;;  %s301_s0 = inlined_call_operand.vmem [shape: bf16[16,64], index: 0, kind: input, shape index: {}]   ;;  %s302_s1 = inlined_call_operand.vmem [shape: f32[1,64], index: 1, kind: input, shape index: {}]   ;;  %s303_s2 = inlined_call_operand.vmem [shape: f32[1,64], index: 2, kind: input, shape index: {}]   ;;  %s304_s3 = inlined_call_operand.vmem [shape: bf16[16,64], index: 3, kind: output, shape index: {}]  }
   0x1 LB: > { %s237_s13 = sadd.s32 4294967295, %s262_s12   ;;  %p241_p0 = scmp.ge.s32.totalorder %s262_s12, 1  ;;  %s262_s12 = sphi %s284_s12, %s13_s12  }
   0x2   : > { %p136_p1 = scmp.lt.s32.totalorder %s262_s12, 3 }
   0x4   : > { %p137_p2 = pnand %p241_p0, %p136_p1 }
   0x5   : > { %p158_p3 = scmp.lt.s32.totalorder (!%p137_p2), %s237_s13, 1 }
   0x6   : > { %140 = sbr.rel (%p137_p2) target bundleno = 27 (0x1b), region = 32 }
   0xb   : > { %s306_s13 = smov (!%p158_p3, %s237_s13), 1  ;;  %v254_v0 = vld [vmem:[%s302_s1] ss:$0 sm:$0xff]  ;;  %vm182_vm1 = vcmask 519168  }
   0xc   : > { %s242_s14 = sshll.u32 %s306_s13, 2  ;;  %v255_v3 = vld [vmem:[%s303_s2] ss:$0 sm:$0xff] }
   0xd   : > { %s161_s17 = scalar_lea.vmem %s301_s0, %s242_s14  ;;  %s165_s24 = scalar_lea.vmem %s304_s3, %s242_s14 }
   0xe   : > { %v166_v1 = vld [vmem:[%s161_s17] sm:$0xf] }
   0xf   : > { %v167_v2 = vunpack.c.l.bf16 %v166_v1 }
  0x11   : > { %v172_v4 = vmul.f32 %v254_v0, %v167_v2 }
  0x13   : > { %v177_v5 = vadd.f32 %v255_v3, %v172_v4 }
  0x15   : > { %vm178_vm0 = vcmp.gt.f32.partialorder %v177_v5, 0.0  ;;  %v179_v6 = vmul.f32 0.2, %v177_v5 }
  0x17   : > { %v180_v7 = vsel %vm178_vm0, %v177_v5, %v179_v6 }
  0x18   : > { %v181_v8 = vpack.c.bf16 %v180_v7, %v180_v7 }
  0x1a   : > { %183 = vst.msk [vmem:[%s165_s24] sm:$0xf] %vm182_vm1, %v181_v8 }
  0x1b PF: > { %s13_s12 = sadd.s32 1, %s262_s12  }
  0x1c   : > { %p10_p4 = scmp.ge.s32.totalorder %s13_s12, 4  }
  0x1e   :  { %12 = sbr.rel (!%p10_p4) target bundleno = 1 (0x1), region = 62 }

</bundles_post_ra>
